<compile_context>
chip_gen: v7x
topology: tpu7x:2x2x1
jax: 0.10.0
libtpu: 0.0.40
codegen_flags: <defaults>
</compile_context>

<pallas_src>
import jax
import jax.numpy as jnp
from jax.experimental import pallas as pl
from jax.experimental.pallas import tpu as pltpu


def _sdpa_kernel(scale_ref, q_ref, k_ref, v_ref, o_ref):
    # q_ref: (bh, Lq, D)  k_ref: (bh, Lk, D)  v_ref: (bh, Lk, Dv)  o_ref: (bh, Lq, Dv)
    scale = scale_ref[0]

    # Fold the learned scale into q once, slab-wide: (q*scale)@k^T == (q@k^T)*scale.
    qs = q_ref[...] * scale

    # Batched contraction over the shared last dim (no transpose materialized).
    s = jnp.einsum("bqd,bkd->bqk", qs, k_ref[...],
                   preferred_element_type=jnp.float32)

    # Numerically stable softmax over the last dim (exact normalization).
    m = jnp.max(s, axis=-1, keepdims=True)
    p = jnp.exp(s - m)
    denom = jnp.sum(p, axis=-1, keepdims=True)
    p = p / denom

    # dropout_p = 0.0 -> identity.
    # TODO(synk): nonzero dropout_p would need pltpu.prng_seed/prng_random_bits masking.

    o = jnp.einsum("bqk,bkd->bqd", p.astype(v_ref.dtype), v_ref[...],
                   preferred_element_type=jnp.float32)
    o_ref[...] = o.astype(o_ref.dtype)


def sdpa_pallas(q, k, v, scale_factor, dropout_p=0.0):
    """Equivalent of Model.forward. q:(B,H,Lq,D), k:(B,H,Lk,D), v:(B,H,Lk,Dv)."""
    assert dropout_p == 0.0, "only dropout_p=0.0 supported"
    B, H, Lq, D = q.shape
    _, _, Lk, Dk = k.shape
    _, _, Lkv, Dv = v.shape
    assert Dk == D and Lkv == Lk
    BH = B * H

    # Free reshapes (no data movement): (B,H,L,D) -> (BH,L,D).
    q3 = q.reshape(BH, Lq, D)
    k3 = k.reshape(BH, Lk, D)
    v3 = v.reshape(BH, Lk, Dv)
    # scale_factor is a (1,1,1,1) parameter -> flatten to a scalar vector in SMEM.
    scale = jnp.asarray(scale_factor, jnp.float32).reshape(1)

    # Split the head axis across grid steps so v7x's two TensorCores both get work.
    n_blk = 2 if (BH % 2 == 0 and BH >= 2) else 1
    bh_blk = BH // n_blk

    out3 = pl.pallas_call(
        _sdpa_kernel,
        out_shape=jax.ShapeDtypeStruct((BH, Lq, Dv), q.dtype),
        grid_spec=pltpu.PrefetchScalarGridSpec(
            num_scalar_prefetch=0,
            grid=(n_blk,),
            in_specs=[
                pl.BlockSpec(memory_space=pltpu.SMEM),                   # scale
                pl.BlockSpec((bh_blk, Lq, D), lambda i: (i, 0, 0)),      # q
                pl.BlockSpec((bh_blk, Lk, D), lambda i: (i, 0, 0)),      # k
                pl.BlockSpec((bh_blk, Lk, Dv), lambda i: (i, 0, 0)),     # v
            ],
            out_specs=pl.BlockSpec((bh_blk, Lq, Dv), lambda i: (i, 0, 0)),
        ),
        compiler_params=pltpu.CompilerParams(
            dimension_semantics=("parallel",)),
    )(scale, q3, k3, v3)

    # TODO(synk): for realistic Lq/Lk (2K-8K) replace the full-Lk-resident softmax with
    # a flash-style kv-tiled online-softmax accumulator sized for v7x's 64 MiB VMEM.
    return out3.reshape(B, H, Lq, Dv)


def reference(q, k, v, scale_factor):
    # HIGHEST precision so the reference is a true f32 baseline (XLA's default TPU
    # matmul precision is single-pass bf16, which is *less* accurate than the kernel).
    s = jnp.einsum("bhqd,bhkd->bhqk", q, k,
                   precision=jax.lax.Precision.HIGHEST) * scale_factor
    p = jax.nn.softmax(s, axis=-1)
    return jnp.einsum("bhqk,bhkd->bhqd", p, v,
                      precision=jax.lax.Precision.HIGHEST)


if __name__ == "__main__":
    key = jax.random.PRNGKey(0)
    kq, kk, kv = jax.random.split(key, 3)

    B, H, Lq, Lk, D, Dv = 1, 8, 64, 32, 32, 32
    q = jax.random.normal(kq, (B, H, Lq, D), dtype=jnp.float32)
    k = jax.random.normal(kk, (B, H, Lk, D), dtype=jnp.float32)
    v = jax.random.normal(kv, (B, H, Lk, Dv), dtype=jnp.float32)

    # Parameter init: torch.ones(1,1,1,1), deterministic.
    scale_factor = jnp.ones((1, 1, 1, 1), dtype=jnp.float32)

    out = jax.block_until_ready(sdpa_pallas(q, k, v, scale_factor, dropout_p=0.0))
    ref = reference(q, k, v, scale_factor)

    assert out.shape == (B, H, Lq, Dv)
    max_err = float(jnp.max(jnp.abs(out - ref)))
    assert jnp.allclose(out, ref, atol=5e-3, rtol=5e-3), f"max_abs_err={max_err}"

    print("KERNEL_OK")
</pallas_src>

<mosaic_0001>
module attributes {stable_mosaic.version = 11 : i64} {
  func.func @_sdpa_kernel(%arg0: i32, %arg1: memref<1xf32, #tpu.memory_space<smem>>, %arg2: memref<4x64x32xf32, #tpu.memory_space<vmem>>, %arg3: memref<4x32x32xf32, #tpu.memory_space<vmem>>, %arg4: memref<4x32x32xf32, #tpu.memory_space<vmem>>, %arg5: memref<4x64x32xf32, #tpu.memory_space<vmem>>) attributes {dimension_semantics = [#tpu.dimension_semantics<parallel>], iteration_bounds = array<i64: 2>, scalar_prefetch = 0 : i64, scratch_operands = 0 : i64, tpu.core_type = #tpu.core_type<tc>, window_params = [{transform_indices = @transform_0, window_bounds = array<i64: 1>}, {transform_indices = @transform_1, window_bounds = array<i64: 4, 64, 32>}, {transform_indices = @transform_2, window_bounds = array<i64: 4, 32, 32>}, {transform_indices = @transform_3, window_bounds = array<i64: 4, 32, 32>}, {transform_indices = @transform_4, window_bounds = array<i64: 4, 64, 32>}]} {
    %c0 = arith.constant 0 : index
    %0 = memref.load %arg1[%c0] : memref<1xf32, #tpu.memory_space<smem>>
    %c0_0 = arith.constant 0 : index
    %c0_1 = arith.constant 0 : index
    %c0_2 = arith.constant 0 : index
    %1 = vector.load %arg2[%c0_0, %c0_1, %c0_2] : memref<4x64x32xf32, #tpu.memory_space<vmem>>, vector<4x64x32xf32>
    %2 = vector.broadcast %0 : f32 to vector<4x64x32xf32>
    %3 = arith.mulf %1, %2 : vector<4x64x32xf32>
    %c0_3 = arith.constant 0 : index
    %c0_4 = arith.constant 0 : index
    %c0_5 = arith.constant 0 : index
    %4 = vector.load %arg3[%c0_3, %c0_4, %c0_5] : memref<4x32x32xf32, #tpu.memory_space<vmem>>, vector<4x32x32xf32>
    "tpu.trace_start"() <{level = 10 : i32, message = "bqd,bkd->bqk"}> : () -> ()
    %cst = arith.constant dense<0.000000e+00> : vector<4x64x32xf32>
    %5 = tpu.matmul %3, %4, %cst {dimension_numbers = #tpu.dot_dimension_numbers<[2], [2], [1], [1], [0, 0, 0, 1, 1, 1], [0], [0]>} : vector<4x64x32xf32>, vector<4x32x32xf32>, vector<4x64x32xf32> -> vector<4x64x32xf32>
    "tpu.trace_stop"() : () -> ()
    %cst_6 = arith.constant dense<0xFF800000> : vector<4x64xf32>
    %6 = vector.multi_reduction <maximumf>, %5, %cst_6 [2] : vector<4x64x32xf32> to vector<4x64xf32>
    %7 = vector.shape_cast %6 : vector<4x64xf32> to vector<4x64x1xf32>
    %8 = vector.broadcast %7 : vector<4x64x1xf32> to vector<4x64x32xf32>
    %9 = arith.subf %5, %8 : vector<4x64x32xf32>
    %10 = math.exp %9 : vector<4x64x32xf32>
    %cst_7 = arith.constant dense<0.000000e+00> : vector<4x64xf32>
    %11 = vector.multi_reduction <add>, %10, %cst_7 [2] : vector<4x64x32xf32> to vector<4x64xf32>
    %12 = vector.shape_cast %11 : vector<4x64xf32> to vector<4x64x1xf32>
    %13 = vector.broadcast %12 : vector<4x64x1xf32> to vector<4x64x32xf32>
    %14 = arith.divf %10, %13 : vector<4x64x32xf32>
    %c0_8 = arith.constant 0 : index
    %c0_9 = arith.constant 0 : index
    %c0_10 = arith.constant 0 : index
    %15 = vector.load %arg4[%c0_8, %c0_9, %c0_10] : memref<4x32x32xf32, #tpu.memory_space<vmem>>, vector<4x32x32xf32>
    "tpu.trace_start"() <{level = 10 : i32, message = "bqk,bkd->bqd"}> : () -> ()
    %cst_11 = arith.constant dense<0.000000e+00> : vector<4x64x32xf32>
    %16 = tpu.matmul %14, %15, %cst_11 {dimension_numbers = #tpu.dot_dimension_numbers<[2], [1], [1], [2], [0, 0, 0, 1, 1, 2], [0], [0]>} : vector<4x64x32xf32>, vector<4x32x32xf32>, vector<4x64x32xf32> -> vector<4x64x32xf32>
    "tpu.trace_stop"() : () -> ()
    %c0_12 = arith.constant 0 : index
    %c0_13 = arith.constant 0 : index
    %c0_14 = arith.constant 0 : index
    %17 = vector.load %arg5[%c0_12, %c0_13, %c0_14] : memref<4x64x32xf32, #tpu.memory_space<vmem>>, vector<4x64x32xf32>
    tpu.vector_store %arg5[%c0_12, %c0_13, %c0_14], %16 {strides = array<i32>} : memref<4x64x32xf32, #tpu.memory_space<vmem>>, vector<4x64x32xf32>,
    return
  }
  func.func @transform_0(%arg0: i32) -> i32 {
    %c0_i32 = arith.constant 0 : i32
    %c0_i32_0 = arith.constant 0 : i32
    return %c0_i32 : i32
  }
  func.func @transform_1(%arg0: i32) -> (i32, i32, i32) {
    %c0_i32 = arith.constant 0 : i32
    %c0_i32_0 = arith.constant 0 : i32
    %c0_i32_1 = arith.constant 0 : i32
    return %arg0, %c0_i32, %c0_i32_0 : i32, i32, i32
  }
  func.func @transform_2(%arg0: i32) -> (i32, i32, i32) {
    %c0_i32 = arith.constant 0 : i32
    %c0_i32_0 = arith.constant 0 : i32
    %c0_i32_1 = arith.constant 0 : i32
    return %arg0, %c0_i32, %c0_i32_0 : i32, i32, i32
  }
  func.func @transform_3(%arg0: i32) -> (i32, i32, i32) {
    %c0_i32 = arith.constant 0 : i32
    %c0_i32_0 = arith.constant 0 : i32
    %c0_i32_1 = arith.constant 0 : i32
    return %arg0, %c0_i32, %c0_i32_0 : i32, i32, i32
  }
  func.func @transform_4(%arg0: i32) -> (i32, i32, i32) {
    %c0_i32 = arith.constant 0 : i32
    %c0_i32_0 = arith.constant 0 : i32
    %c0_i32_1 = arith.constant 0 : i32
    return %arg0, %c0_i32, %c0_i32_0 : i32, i32, i32
  }
}

</mosaic_0001>

<bundles_post_ra>
// kernel: tpu_custom_call.1
= control target key start
LH: loop header
LB: loop body
LE: loop exit
PB: predicated region body
PF: predicated region fallthrough
CT: control target
= control target key end

     0   :  { %s2513_s17 = smov 0   ;;  %s3140_s0 = inlined_call_operand.<no memory space> [shape: f32[1], index: 0, kind: input, shape index: {}]   ;;  %s3141_s1 = inlined_call_operand.vmem [shape: f32[8,64,32], index: 1, kind: input, shape index: {}]   ;;  %s3142_s2 = inlined_call_operand.vmem [shape: f32[8,32,32], index: 2, kind: input, shape index: {}]   ;;  %s3143_s3 = inlined_call_operand.vmem [shape: f32[8,32,32], index: 3, kind: input, shape index: {}]   ;;  %s3144_s4 = inlined_call_operand.vmem [shape: f32[8,64,32], index: 4, kind: output, shape index: {}]  }
   0x1   :  { %9 = sst [smem:[#allocation2]] %s3140_s0 }
   0x2 LB: > { %s1902_s18 = sadd.s32 4294967295, %s2483_s17   ;;  %p1906_p0 = scmp.ge.s32.totalorder %s2483_s17, 1  ;;  %s2483_s17 = sphi %s2513_s17, %s15_s17  }
   0x3   : > { %p189_p1 = scmp.lt.s32.totalorder %s2483_s17, 3 }
   0x5   : > { %p190_p2 = pnand %p1906_p0, %p189_p1 }
   0x6   : > { %s1907_s19 = sshll.u32 (!%p190_p2), %s1902_s18, 2  ;;  %s257_s20 = sld [smem:[#allocation2]] (!%p190_p2)  ;;  %vm339_vm0 = vcmask (!%p190_p2), 261120  }
   0x7   : > { %193 = sbr.rel (%p190_p2) target bundleno = 841 (0x349), region = 36  ;;  %p230_p3 = scmp.lt.s32.totalorder (!%p190_p2), %s1907_s19, 7  ;;  %vm2541_vm1 = vmpackc.low (!%p190_p2), %vm339_vm0, %vm339_vm0 }
   0xc   : > { %v2548_v4 = vstv (!%p190_p2), %s257_s20 }
   0xe   : > { %s3148_s19 = smov (!%p230_p3, %s1907_s19), 7 }
   0xf   : > { %s2001_s0 = sshll.u32 %s3148_s19, 6  ;;  %s2002_s21 = sshll.u32 %s3148_s19, 5 }
  0x10   : > { %s2530_s24 = scalar_lea.vmem %s3141_s1, %s2001_s0  ;;  %s2537_s27 = scalar_lea.vmem %s3142_s2, %s2002_s21 }
  0x11   : > { %v323_v1 = vld [vmem:[%s2537_s27] sm:$0xff]  ;;  %v324_v2 = vld [vmem:[%s2537_s27 + $0x8] sm:$0xff]  ;;  %v325_v7 = vld [vmem:[%s2537_s27 + $0x10] sm:$0xff]  ;;  %s2882_s30 = scalar_lea.vmem %s3143_s3, %s2002_s21  ;;  %s3071_s7 = scalar_lea.vmem %s3144_s4, %s2001_s0 }
  0x12   : > { %v327_v3 = vld [vmem:[%s2537_s27 + $0x20] sm:$0xff]  ;;  %v2261_v5 = vpack.c.bf16 %v324_v2, %v323_v1  ;;  %v328_v6 = vld [vmem:[%s2537_s27 + $0x28] sm:$0xff]  ;;  %v326_v8 = vld [vmem:[%s2537_s27 + $0x18] sm:$0xff] }
  0x13   : > { %v2273_v9 = vpack.c.bf16 %v328_v6, %v327_v3  ;;  %v2267_v10 = vpack.c.bf16 %v326_v8, %v325_v7  ;;  %v329_v11 = vld [vmem:[%s2537_s27 + $0x30] sm:$0xff]  ;;  %v330_v12 = vld [vmem:[%s2537_s27 + $0x38] sm:$0xff]  ;;  %v258_v13 = vld [vmem:[%s2530_s24] sm:$0xff] }
  0x14   : > { %2263 = vmatprep.subr.msk.bf16.mxu0 %vm2541_vm1, %v2261_v5  ;;  %v2279_v14 = vpack.c.bf16 %v330_v12, %v329_v11  ;;  %v291_v15 = vmul.f32 %v2548_v4, %v258_v13  ;;  %v266_v16 = vld [vmem:[%s2530_s24 + $0x40] sm:$0xff]  ;;  %v332_v19 = vld [vmem:[%s2537_s27 + $0x48] sm:$0xff]  ;;  %v260_v26 = vld [vmem:[%s2530_s24 + $0x10] sm:$0xff] }
  0x15   : > { %2275 = vmatprep.subr.msk.bf16.mxu1 %vm2541_vm1, %v2273_v9  ;;  %2266 = vmatpush3.bf16.xpose.msk.msra.mxu0 %vm2541_vm1, %v2261_v5  ;;  %v299_v17 = vmul.f32 %v2548_v4, %v266_v16  ;;  %v331_v18 = vld [vmem:[%s2537_s27 + $0x40] sm:$0xff]  ;;  %v336_v21 = vld [vmem:[%s2537_s27 + $0x68] sm:$0xff]  ;;  %v268_v27 = vld [vmem:[%s2530_s24 + $0x50] sm:$0xff]  ;;  %v293_v32 = vmul.f32 %v2548_v4, %v260_v26 }
  0x16   : > { %2278 = vmatpush3.bf16.xpose.msk.msra.mxu1 %vm2541_vm1, %v2273_v9  ;;  %2269 = vmatprep.subr.msk.bf16.mxu0 %vm2541_vm1, %v2267_v10  ;;  %v335_v20 = vld [vmem:[%s2537_s27 + $0x60] sm:$0xff]  ;;  %v2285_v22 = vpack.c.bf16 %v332_v19, %v331_v18  ;;  %v259_v24 = vld [vmem:[%s2530_s24 + $0x8] sm:$0xff]  ;;  %v333_v29 = vld [vmem:[%s2537_s27 + $0x50] sm:$0xff]  ;;  %v301_v36 = vmul.f32 %v2548_v4, %v268_v27 }
  0x17   : > { %2281 = vmatprep.subr.msk.bf16.mxu1 %vm2541_vm1, %v2279_v14  ;;  %2109 = vmatprep.mubr.msk.f32.mxu0 %vm339_vm0, %v291_v15  ;;  %v2297_v23 = vpack.c.bf16 %v336_v21, %v335_v20  ;;  %v267_v25 = vld [vmem:[%s2530_s24 + $0x48] sm:$0xff]  ;;  %v292_v28 = vmul.f32 %v2548_v4, %v259_v24  ;;  %v334_v30 = vld [vmem:[%s2537_s27 + $0x58] sm:$0xff]  ;;  %v337_v34 = vld [vmem:[%s2537_s27 + $0x70] sm:$0xff] }
  0x18   : > { %2129 = vmatprep.mubr.msk.f32.mxu1 %vm339_vm0, %v299_v17  ;;  %v300_v31 = vmul.f32 %v2548_v4, %v267_v25  ;;  %v261_v33 = vld [vmem:[%s2530_s24 + $0x18] sm:$0xff]  ;;  %v262_v38 = vld [vmem:[%s2530_s24 + $0x20] sm:$0xff]  ;;  %v2291_v40 = vpack.c.bf16 %v334_v30, %v333_v29  ;;  %v263_v45 = vld [vmem:[%s2530_s24 + $0x28] sm:$0xff] }
  0x19   : > { %v338_v35 = vld [vmem:[%s2537_s27 + $0x78] sm:$0xff]  ;;  %v270_v39 = vld [vmem:[%s2530_s24 + $0x60] sm:$0xff]  ;;  %v294_v41 = vmul.f32 %v2548_v4, %v261_v33  ;;  %v295_v44 = vmul.f32 %v2548_v4, %v262_v38  ;;  %v271_v47 = vld [vmem:[%s2530_s24 + $0x68] sm:$0xff]  ;;  %v296_v50 = vmul.f32 %v2548_v4, %v263_v45 }
  0x1a   : > { %v269_v37 = vld [vmem:[%s2530_s24 + $0x58] sm:$0xff]  ;;  %v2303_v42 = vpack.c.bf16 %v338_v35, %v337_v34  ;;  %v303_v46 = vmul.f32 %v2548_v4, %v270_v39  ;;  %v264_v48 = vld [vmem:[%s2530_s24 + $0x30] sm:$0xff]  ;;  %v304_v51 = vmul.f32 %v2548_v4, %v271_v47  ;;  %v274_v56 = vld [vmem:[%s2530_s24 + $0x80] sm:$0xff] }
  0x1b   : > { %v302_v43 = vmul.f32 %v2548_v4, %v269_v37  ;;  %v272_v49 = vld [vmem:[%s2530_s24 + $0x70] sm:$0xff]  ;;  %v297_v52 = vmul.f32 %v2548_v4, %v264_v48  ;;  %v265_v53 = vld [vmem:[%s2530_s24 + $0x38] sm:$0xff]  ;;  %v282_v57 = vld [vmem:[%s2530_s24 + $0xc0] sm:$0xff]  ;;  %v307_v60 = vmul.f32 %v2548_v4, %v274_v56 }
  0x1c   : > { %v305_v54 = vmul.f32 %v2548_v4, %v272_v49  ;;  %v273_v55 = vld [vmem:[%s2530_s24 + $0x78] sm:$0xff]  ;;  %v298_v58 = vmul.f32 %v2548_v4, %v265_v53  ;;  %v275_v61 = vld [vmem:[%s2530_s24 + $0x88] sm:$0xff]  ;;  %v315_v62 = vmul.f32 %v2548_v4, %v282_v57  ;;  %v276_v1 = vld [vmem:[%s2530_s24 + $0x90] sm:$0xff] }
  0x1d   : > { %2272 = vmatpush3.bf16.xpose.msk.msra.mxu0 %vm2541_vm1, %v2267_v10  ;;  %v306_v59 = vmul.f32 %v2548_v4, %v273_v55  ;;  %v283_v63 = vld [vmem:[%s2530_s24 + $0xc8] sm:$0xff]  ;;  %v284_v2 = vld [vmem:[%s2530_s24 + $0xd0] sm:$0xff]  ;;  %v308_v3 = vmul.f32 %v2548_v4, %v275_v61  ;;  %v309_v0 = vmul.f32 %v2548_v4, %v276_v1  ;;  %v277_v6 = vld [vmem:[%s2530_s24 + $0x98] sm:$0xff] }
  0x1e   : > { %2284 = vmatpush3.bf16.xpose.msk.msra.mxu1 %vm2541_vm1, %v2279_v14  ;;  %2287 = vmatprep.subr.msk.bf16.mxu0 %vm2541_vm1, %v2285_v22  ;;  %v316_v5 = vmul.f32 %v2548_v4, %v283_v63  ;;  %v317_v7 = vmul.f32 %v2548_v4, %v284_v2  ;;  %v285_v8 = vld [vmem:[%s2530_s24 + $0xd8] sm:$0xff]  ;;  %v278_v9 = vld [vmem:[%s2530_s24 + $0xa0] sm:$0xff]  ;;  %v310_v11 = vmul.f32 %v2548_v4, %v277_v6  ;;  %v279_v14 = vld [vmem:[%s2530_s24 + $0xa8] sm:$0xff] }
  0x1f   : > { %2299 = vmatprep.subr.msk.bf16.mxu1 %vm2541_vm1, %v2297_v23  ;;  %v286_v10 = vld [vmem:[%s2530_s24 + $0xe0] sm:$0xff]  ;;  %v318_v12 = vmul.f32 %v2548_v4, %v285_v8  ;;  %v311_v13 = vmul.f32 %v2548_v4, %v278_v9  ;;  %v287_v16 = vld [vmem:[%s2530_s24 + $0xe8] sm:$0xff]  ;;  %v280_v17 = vld [vmem:[%s2530_s24 + $0xb0] sm:$0xff]  ;;  %v312_v19 = vmul.f32 %v2548_v4, %v279_v14 }
  0x20   : > { %v319_v15 = vmul.f32 %v2548_v4, %v286_v10  ;;  %v288_v18 = vld [vmem:[%s2530_s24 + $0xf0] sm:$0xff]  ;;  %v320_v20 = vmul.f32 %v2548_v4, %v287_v16  ;;  %v313_v21 = vmul.f32 %v2548_v4, %v280_v17  ;;  %v289_v24 = vld [vmem:[%s2530_s24 + $0xf8] sm:$0xff] }
  0x21   : > { %v322_v26 = vmul.f32 %v2548_v4, %v289_v24 }
  0x24   : > { %2110 = vmatmul.mubr.msk.f32.vlgmr.msra.gmra.mrb[0].mxu0 %vm339_vm0, %v292_v28 }
  0x25   : > { %2130 = vmatmul.mubr.msk.f32.vlgmr.msra.gmra.mrb[0].mxu1 %vm339_vm0, %v300_v31  ;;  %2112 = vmatprep.mubr.msk.f32.mxu0 %vm339_vm0, %v293_v32 }
  0x26   : > { %2132 = vmatprep.mubr.msk.f32.mxu1 %vm339_vm0, %v301_v36  ;;  %2290 = vmatpush3.bf16.xpose.msk.msra.mxu0 %vm2541_vm1, %v2285_v22  ;;  %v281_v22 = vld [vmem:[%s2530_s24 + $0xb8] sm:$0xff] }
  0x27   : > { %2302 = vmatpush3.bf16.xpose.msk.msra.mxu1 %vm2541_vm1, %v2297_v23  ;;  %2293 = vmatprep.subr.msk.bf16.mxu0 %vm2541_vm1, %v2291_v40  ;;  %v321_v23 = vmul.f32 %v2548_v4, %v288_v18  ;;  %v314_v25 = vmul.f32 %v2548_v4, %v281_v22 }
  0x28   : > { %2113 = vmatmul.mubr.msk.f32.gmra.mrb[2].mxu0 %vm339_vm0, %v294_v41  ;;  %2305 = vmatprep.subr.msk.bf16.mxu1 %vm2541_vm1, %v2303_v42 }
  0x29   : > { %2133 = vmatmul.mubr.msk.f32.gmra.mrb[2].mxu1 %vm339_vm0, %v302_v43  ;;  %2115 = vmatprep.mubr.msk.f32.mxu0 %vm339_vm0, %v295_v44 }
  0x2a   : > { %2135 = vmatprep.mubr.msk.f32.mxu1 %vm339_vm0, %v303_v46 }
  0x2c   : > { %2116 = vmatmul.mubr.msk.f32.gmra.mrb[4].mxu0 %vm339_vm0, %v296_v50 }
  0x2d   : > { %2136 = vmatmul.mubr.msk.f32.gmra.mrb[4].mxu1 %vm339_vm0, %v304_v51  ;;  %2118 = vmatprep.mubr.msk.f32.mxu0 %vm339_vm0, %v297_v52 }
  0x2e   : > { %2296 = vmatpush3.bf16.xpose.msk.msra.mxu0 %vm2541_vm1, %v2291_v40  ;;  %2138 = vmatprep.mubr.msk.f32.mxu1 %vm339_vm0, %v305_v54 }
  0x2f   : > { %2308 = vmatpush3.bf16.xpose.msk.msra.mxu1 %vm2541_vm1, %v2303_v42 }
  0x30   : > { %2119 = vmatmul.mubr.msk.f32.gmra.mrb[6].mxu0 %vm339_vm0, %v298_v58 }
  0x31   : > { %2139 = vmatmul.mubr.msk.f32.gmra.mrb[6].mxu1 %vm339_vm0, %v306_v59  ;;  %2149 = vmatprep.mubr.msk.f32.mxu0 %vm339_vm0, %v307_v60 }
  0x32   : > { %2169 = vmatprep.mubr.msk.f32.mxu1 %vm339_vm0, %v315_v62 }
  0x35   : > { %2150 = vmatmul.mubr.msk.f32.vlgmr.msra.gmra.mrb[8].mxu0 %vm339_vm0, %v308_v3 }
  0x36   : > { %2170 = vmatmul.mubr.msk.f32.vlgmr.msra.gmra.mrb[8].mxu1 %vm339_vm0, %v316_v5  ;;  %2152 = vmatprep.mubr.msk.f32.mxu0 %vm339_vm0, %v309_v0 }
  0x37   : > { %2172 = vmatprep.mubr.msk.f32.mxu1 %vm339_vm0, %v317_v7 }
  0x39   : > { %2153 = vmatmul.mubr.msk.f32.gmra.mrb[10].mxu0 %vm339_vm0, %v310_v11 }
  0x3a   : > { %2173 = vmatmul.mubr.msk.f32.gmra.mrb[10].mxu1 %vm339_vm0, %v318_v12  ;;  %2155 = vmatprep.mubr.msk.f32.mxu0 %vm339_vm0, %v311_v13 }
  0x3b   : > { %2175 = vmatprep.mubr.msk.f32.mxu1 %vm339_vm0, %v319_v15 }
  0x3d   : > { %2156 = vmatmul.mubr.msk.f32.gmra.mrb[12].mxu0 %vm339_vm0, %v312_v19 }
  0x3e   : > { %2176 = vmatmul.mubr.msk.f32.gmra.mrb[12].mxu1 %vm339_vm0, %v320_v20  ;;  %2158 = vmatprep.mubr.msk.f32.mxu0 %vm339_vm0, %v313_v21 }
  0x3f   : > { %2178 = vmatprep.mubr.msk.f32.mxu1 %vm339_vm0, %v321_v23 }
  0x41   : > { %2159 = vmatmul.mubr.msk.f32.gmra.mrb[14].mxu0 %vm339_vm0, %v314_v25 }
  0x42   : > { %2179 = vmatmul.mubr.msk.f32.gmra.mrb[14].mxu1 %vm339_vm0, %v322_v26 }
  0xf7   : > { %v2691_v27 = vpop.f32.mrb[0].mxu0 }
  0xf8   : > { %v2693_v28 = vpop.f32.mrb[0].mxu1  ;;  %v2695_v29 = vpop.f32.mrb[1].mxu0  ;;  %v907_v30 = vsel %vm339_vm0, %v2691_v27, -inf }
  0xf9   : > { %v931_v31 = vsel %vm339_vm0, %v2693_v28, -inf  ;;  %908 = vmax.xlane.f32.xlu0 %v907_v30  ;;  %v2701_v4 = vpop.f32.mrb[1].mxu1  ;;  %v904_v34 = vsel %vm339_vm0, %v2695_v29, -inf }
  0xfa   : > { %932 = vmax.xlane.f32.xlu1 %v931_v31  ;;  %v928_v32 = vsel %vm339_vm0, %v2701_v4, -inf }
  0xfb   : > { %v2705_v33 = vpop.f32.mrb[2].mxu0 }
  0xfc   : > { %v2709_v35 = vpop.f32.mrb[3].mxu0  ;;  %v2711_v36 = vpop.f32.mrb[2].mxu1  ;;  %v913_v39 = vsel %vm339_vm0, %v2705_v33, -inf }
  0xfd   : > { %905 = vmax.xlane.f32.xlu0 %v904_v34  ;;  %v2713_v37 = vpop.f32.mrb[3].mxu1  ;;  %v910_v38 = vsel %vm339_vm0, %v2709_v35, -inf  ;;  %v937_v45 = vsel %vm339_vm0, %v2711_v36, -inf }
  0xfe   : > { %929 = vmax.xlane.f32.xlu1 %v928_v32  ;;  %v934_v44 = vsel %vm339_vm0, %v2713_v37, -inf }
  0xff   : > { %v2719_v40 = vpop.f32.mrb[4].mxu0 }
 0x100   : > { %v2721_v41 = vpop.f32.mrb[5].mxu0  ;;  %v2723_v42 = vpop.f32.mrb[4].mxu1  ;;  %v919_v51 = vsel %vm339_vm0, %v2719_v40, -inf }
 0x101   : > { %911 = vmax.xlane.f32.xlu0 %v910_v38  ;;  %v2725_v43 = vpop.f32.mrb[5].mxu1  ;;  %v916_v50 = vsel %vm339_vm0, %v2721_v41, -inf  ;;  %v943_v57 = vsel %vm339_vm0, %v2723_v42, -inf }
 0x102   : > { %914 = vmax.xlane.f32.xlu1 %v913_v39  ;;  %v940_v55 = vsel %vm339_vm0, %v2725_v43, -inf }
 0x103   : > { %v2731_v46 = vpop.f32.mrb[6].mxu0 }
 0x104   : > { %v2733_v47 = vpop.f32.mrb[7].mxu0  ;;  %v2735_v48 = vpop.f32.mrb[6].mxu1  ;;  %v925_v63 = vsel %vm339_vm0, %v2731_v46, -inf }
 0x105   : > { %935 = vmax.xlane.f32.xlu0 %v934_v44  ;;  %v2737_v49 = vpop.f32.mrb[7].mxu1  ;;  %v922_v61 = vsel %vm339_vm0, %v2733_v47, -inf  ;;  %v949_v6 = vsel %vm339_vm0, %v2735_v48, -inf }
 0x106   : > { %938 = vmax.xlane.f32.xlu1 %v937_v45  ;;  %v946_v5 = vsel %vm339_vm0, %v2737_v49, -inf }
 0x108   : > { %v2743_v52 = vpop.f32.mrb[8].mxu0 }
 0x109   : > { %917 = vmax.xlane.f32.xlu0 %v916_v50  ;;  %v2745_v53 = vpop.f32.mrb[9].mxu0  ;;  %v2747_v54 = vpop.f32.mrb[8].mxu1  ;;  %v955_v12 = vsel %vm339_vm0, %v2743_v52, -inf }
 0x10a   : > { %920 = vmax.xlane.f32.xlu1 %v919_v51  ;;  %v2751_v56 = vpop.f32.mrb[9].mxu1  ;;  %v952_v10 = vsel %vm339_vm0, %v2745_v53, -inf  ;;  %v979_v14 = vsel %vm339_vm0, %v2747_v54, -inf }
 0x10b   : > { %v976_v13 = vsel %vm339_vm0, %v2751_v56, -inf }
 0x10c   : > { %v2755_v58 = vpop.f32.mrb[10].mxu0 }
 0x10d   : > { %941 = vmax.xlane.f32.xlu0 %v940_v55  ;;  %v2757_v59 = vpop.f32.mrb[11].mxu0  ;;  %v2759_v60 = vpop.f32.mrb[10].mxu1  ;;  %v961_v16 = vsel %vm339_vm0, %v2755_v58, -inf }
 0x10e   : > { %944 = vmax.xlane.f32.xlu1 %v943_v57  ;;  %v2763_v62 = vpop.f32.mrb[11].mxu1  ;;  %v958_v15 = vsel %vm339_vm0, %v2757_v59, -inf  ;;  %v985_v18 = vsel %vm339_vm0, %v2759_v60, -inf }
 0x10f   : > { %v982_v17 = vsel %vm339_vm0, %v2763_v62, -inf }
 0x110   : > { %v2767_v1 = vpop.f32.mrb[12].mxu0 }
 0x111   : > { %923 = vmax.xlane.f32.xlu0 %v922_v61  ;;  %v2769_v2 = vpop.f32.mrb[13].mxu0  ;;  %v2771_v3 = vpop.f32.mrb[12].mxu1  ;;  %v967_v20 = vsel %vm339_vm0, %v2767_v1, -inf }
 0x112   : > { %926 = vmax.xlane.f32.xlu1 %v925_v63  ;;  %v2775_v0 = vpop.f32.mrb[13].mxu1  ;;  %v964_v19 = vsel %vm339_vm0, %v2769_v2, -inf  ;;  %v991_v22 = vsel %vm339_vm0, %v2771_v3, -inf }
 0x113   : > { %v988_v21 = vsel %vm339_vm0, %v2775_v0, -inf }
 0x114   : > { %v2779_v7 = vpop.f32.mrb[14].mxu0 }
 0x115   : > { %947 = vmax.xlane.f32.xlu0 %v946_v5  ;;  %v2781_v8 = vpop.f32.mrb[15].mxu0  ;;  %v2783_v9 = vpop.f32.mrb[14].mxu1  ;;  %v973_v24 = vsel %vm339_vm0, %v2779_v7, -inf }
 0x116   : > { %950 = vmax.xlane.f32.xlu1 %v949_v6  ;;  %v2787_v11 = vpop.f32.mrb[15].mxu1  ;;  %v970_v23 = vsel %vm339_vm0, %v2781_v8, -inf  ;;  %v997_v26 = vsel %vm339_vm0, %v2783_v9, -inf }
 0x117   : > { %v994_v25 = vsel %vm339_vm0, %v2787_v11, -inf }
 0x119   : > { %953 = vmax.xlane.f32.xlu0 %v952_v10 }
 0x11a   : > { %956 = vmax.xlane.f32.xlu1 %v955_v12 }
 0x11d   : > { %977 = vmax.xlane.f32.xlu0 %v976_v13 }
 0x11e   : > { %980 = vmax.xlane.f32.xlu1 %v979_v14 }
 0x121   : > { %959 = vmax.xlane.f32.xlu0 %v958_v15 }
 0x122   : > { %962 = vmax.xlane.f32.xlu1 %v961_v16 }
 0x125   : > { %983 = vmax.xlane.f32.xlu0 %v982_v17 }
 0x126   : > { %986 = vmax.xlane.f32.xlu1 %v985_v18 }
 0x129   : > { %965 = vmax.xlane.f32.xlu0 %v964_v19 }
 0x12a   : > { %968 = vmax.xlane.f32.xlu1 %v967_v20 }
 0x12d   : > { %989 = vmax.xlane.f32.xlu0 %v988_v21 }
 0x12e   : > { %992 = vmax.xlane.f32.xlu1 %v991_v22 }
 0x131   : > { %971 = vmax.xlane.f32.xlu0 %v970_v23 }
 0x132   : > { %974 = vmax.xlane.f32.xlu1 %v973_v24 }
 0x135   : > { %995 = vmax.xlane.f32.xlu0 %v994_v25 }
 0x136   : > { %998 = vmax.xlane.f32.xlu1 %v997_v26 }
 0x186   : > { %v909_v30 = vpop.xlane.xlu0 %908 }
 0x187   : > { %v933_v31 = vpop.xlane.xlu1 %932  ;;  %v1001_v32 = vsub.f32 %v2691_v27, %v909_v30 }
 0x188   : > { %v1009_v34 = vsub.f32 %v2693_v28, %v933_v31 }
 0x189   : > { %v1034_v38 = vmul.f32 1.442695, %v1001_v32 }
 0x18a   : > { %v1050_v39 = vmul.f32 1.442695, %v1009_v34  ;;  %v906_v44 = vpop.xlane.xlu0 %905 }
 0x18b   : > { %2349 = vpow2.f32 %v1034_v38  ;;  %v930_v45 = vpop.xlane.xlu1 %929  ;;  %v1000_v50 = vsub.f32 %v2695_v29, %v906_v44 }
 0x18c   : > { %v1008_v51 = vsub.f32 %v2701_v4, %v930_v45  ;;  %2351 = vpow2.f32 %v1050_v39 }
 0x18d   : > { %v1032_v55 = vmul.f32 1.442695, %v1000_v50 }
 0x18e   : > { %v1048_v57 = vmul.f32 1.442695, %v1008_v51  ;;  %v912_v61 = vpop.xlane.xlu0 %911 }
 0x18f   : > { %2353 = vpow2.f32 %v1032_v55  ;;  %v915_v63 = vpop.xlane.xlu1 %914  ;;  %v1002_v5 = vsub.f32 %v2709_v35, %v912_v61 }
 0x190   : > { %v1003_v27 = vsub.f32 %v2705_v33, %v915_v63  ;;  %2355 = vpow2.f32 %v1048_v57 }
 0x191   : > { %v1036_v28 = vmul.f32 1.442695, %v1002_v5 }
 0x192   : > { %v1038_v6 = vmul.f32 1.442695, %v1003_v27  ;;  %v936_v10 = vpop.xlane.xlu0 %935 }
 0x193   : > { %v939_v12 = vpop.xlane.xlu1 %938  ;;  %v1010_v13 = vsub.f32 %v2713_v37, %v936_v10 }
 0x194   : > { %2357 = vpow2.f32 %v1038_v6  ;;  %v1011_v29 = vsub.f32 %v2711_v36, %v939_v12 }
 0x195   : > { %v2827_v4 = vpop.eup %2349  ;;  %2359 = vpow2.f32 %v1036_v28  ;;  %v1052_v14 = vmul.f32 1.442695, %v1010_v13 }
 0x196   : > { %v1054_v15 = vmul.f32 1.442695, %v1011_v29  ;;  %v918_v16 = vpop.xlane.xlu0 %917  ;;  %v1099_v35 = vsel %vm339_vm0, %v2827_v4, 0.0  ;;  %v2831_v33 = vpop.eup %2351 }
 0x197   : > { %v921_v17 = vpop.xlane.xlu1 %920  ;;  %v1004_v18 = vsub.f32 %v2721_v41, %v918_v16  ;;  %1100 = vadd.xlane.f32.xlu1 %v1099_v35  ;;  %v1123_v22 = vsel %vm339_vm0, %v2831_v33, 0.0 }
 0x198   : > { %2361 = vpow2.f32 %v1054_v15  ;;  %v1005_v37 = vsub.f32 %v2719_v40, %v921_v17 }
 0x199   : > { %v2835_v19 = vpop.eup %2353  ;;  %2363 = vpow2.f32 %v1052_v14  ;;  %v1040_v36 = vmul.f32 1.442695, %v1004_v18 }
 0x19a   : > { %v1042_v20 = vmul.f32 1.442695, %v1005_v37  ;;  %v942_v21 = vpop.xlane.xlu0 %941  ;;  %v1096_v23 = vsel %vm339_vm0, %v2835_v19, 0.0  ;;  %v2841_v24 = vpop.eup %2355 }
 0x19b   : > { %v945_v25 = vpop.xlane.xlu1 %944  ;;  %v1012_v41 = vsub.f32 %v2725_v43, %v942_v21  ;;  %1124 = vadd.xlane.f32.xlu1 %v1123_v22  ;;  %1097 = vadd.xlane.f32.xlu0 %v1096_v23  ;;  %v1120_v34 = vsel %vm339_vm0, %v2841_v24, 0.0  ;;  %v1256_v22 = vld [vmem:[%s2882_s30] sm:$0xff]  ;;  %v1257_v23 = vld [vmem:[%s2882_s30 + $0x8] sm:$0xff] }
 0x19c   : > { %2365 = vpow2.f32 %v1042_v20  ;;  %v1013_v40 = vsub.f32 %v2723_v42, %v945_v25 }
 0x19d   : > { %2367 = vpow2.f32 %v1040_v36  ;;  %v1056_v26 = vmul.f32 1.442695, %v1012_v41 }
 0x19e   : > { %v2845_v30 = vpop.eup %2357  ;;  %v1058_v31 = vmul.f32 1.442695, %v1013_v40  ;;  %v924_v32 = vpop.xlane.xlu0 %923 }
 0x19f   : > { %v2849_v38 = vpop.eup %2359  ;;  %v927_v39 = vpop.xlane.xlu1 %926  ;;  %v1006_v44 = vsub.f32 %v2733_v47, %v924_v32  ;;  %v1105_v43 = vsel %vm339_vm0, %v2845_v30, 0.0  ;;  %1121 = vadd.xlane.f32.xlu0 %v1120_v34 }
 0x1a0   : > { %2369 = vpow2.f32 %v1058_v31  ;;  %v1007_v42 = vsub.f32 %v2731_v46, %v927_v39  ;;  %1106 = vadd.xlane.f32.xlu1 %v1105_v43  ;;  %v1102_v57 = vsel %vm339_vm0, %v2849_v38, 0.0  ;;  %v1258_v43 = vld [vmem:[%s2882_s30 + $0x10] sm:$0xff] }
 0x1a1   : > { %2371 = vpow2.f32 %v1056_v26  ;;  %v1044_v45 = vmul.f32 1.442695, %v1006_v44  ;;  %v2309_v26 = vpack.c.bf16 %v1257_v23, %v1256_v22 }
 0x1a2   : > { %v2855_v50 = vpop.eup %2361  ;;  %v1046_v51 = vmul.f32 1.442695, %v1007_v42  ;;  %v948_v55 = vpop.xlane.xlu0 %947  ;;  %v1259_v42 = vld [vmem:[%s2882_s30 + $0x18] sm:$0xff] }
 0x1a3   : > { %v2859_v61 = vpop.eup %2363  ;;  %v951_v47 = vpop.xlane.xlu1 %950  ;;  %v1014_v63 = vsub.f32 %v2737_v49, %v948_v55  ;;  %v1129_v5 = vsel %vm339_vm0, %v2855_v50, 0.0  ;;  %1103 = vadd.xlane.f32.xlu0 %v1102_v57  ;;  %2310 = vmatprep.subr.bf16.mxu0 %v2309_v26 }
 0x1a4   : > { %2373 = vpow2.f32 %v1046_v51  ;;  %v1015_v46 = vsub.f32 %v2735_v48, %v951_v47  ;;  %1130 = vadd.xlane.f32.xlu1 %v1129_v5  ;;  %v1126_v12 = vsel %vm339_vm0, %v2859_v61, 0.0  ;;  %2312 = vmatpush3.bf16.msra.mxu0 %v2309_v26  ;;  %v2313_v47 = vpack.c.bf16 %v1259_v42, %v1258_v43 }
 0x1a5   : > { %2375 = vpow2.f32 %v1044_v45  ;;  %v1060_v27 = vmul.f32 1.442695, %v1014_v63  ;;  %v1260_v45 = vld [vmem:[%s2882_s30 + $0x20] sm:$0xff]  ;;  %v1261_v63 = vld [vmem:[%s2882_s30 + $0x28] sm:$0xff] }
 0x1a6   : > { %v2865_v28 = vpop.eup %2365  ;;  %v1062_v6 = vmul.f32 1.442695, %v1015_v46  ;;  %v954_v10 = vpop.xlane.xlu0 %953  ;;  %2314 = vmatprep.subr.bf16.mxu0 %v2313_v47 }
 0x1a7   : > { %v2869_v13 = vpop.eup %2367  ;;  %v957_v49 = vpop.xlane.xlu1 %956  ;;  %v1016_v29 = vsub.f32 %v2745_v53, %v954_v10  ;;  %v1111_v14 = vsel %vm339_vm0, %v2865_v28, 0.0  ;;  %1127 = vadd.xlane.f32.xlu0 %v1126_v12 }
 0x1a8   : > { %2377 = vpow2.f32 %v1062_v6  ;;  %v1017_v48 = vsub.f32 %v2743_v52, %v957_v49  ;;  %1112 = vadd.xlane.f32.xlu1 %v1111_v14  ;;  %v1108_v17 = vsel %vm339_vm0, %v2869_v13, 0.0  ;;  %v2317_v6 = vpack.c.bf16 %v1261_v63, %v1260_v45  ;;  %2316 = vmatpush3.bf16.msra.mxu0 %v2313_v47  ;;  %v1262_v49 = vld [vmem:[%s2882_s30 + $0x30] sm:$0xff] }
 0x1a9   : > { %2379 = vpow2.f32 %v1060_v27  ;;  %v1064_v15 = vmul.f32 1.442695, %v1016_v29  ;;  %v1263_v29 = vld [vmem:[%s2882_s30 + $0x38] sm:$0xff] }
 0x1aa   : > { %v2875_v16 = vpop.eup %2369  ;;  %v1066_v53 = vmul.f32 1.442695, %v1017_v48  ;;  %v978_v35 = vpop.xlane.xlu0 %977  ;;  %2318 = vmatprep.subr.bf16.mxu1 %v2317_v6 }
 0x1ab   : > { %v2886_v18 = vpop.eup %2371  ;;  %v981_v52 = vpop.xlane.xlu1 %980  ;;  %v1024_v37 = vsub.f32 %v2751_v56, %v978_v35  ;;  %v1135_v36 = vsel %vm339_vm0, %v2875_v16, 0.0  ;;  %1109 = vadd.xlane.f32.xlu0 %v1108_v17  ;;  %2320 = vmatpush3.bf16.msra.mxu1 %v2317_v6 }
 0x1ac   : > { %2381 = vpow2.f32 %v1066_v53  ;;  %v1025_v20 = vsub.f32 %v2747_v54, %v981_v52  ;;  %1136 = vadd.xlane.f32.xlu1 %v1135_v36  ;;  %v1132_v56 = vsel %vm339_vm0, %v2886_v18, 0.0  ;;  %v2321_v53 = vpack.c.bf16 %v1263_v29, %v1262_v49 }
 0x1ad   : > { %2383 = vpow2.f32 %v1064_v15  ;;  %v1080_v21 = vmul.f32 1.442695, %v1024_v37 }
 0x1ae   : > { %v2894_v25 = vpop.eup %2373  ;;  %v1082_v41 = vmul.f32 1.442695, %v1025_v20  ;;  %v960_v40 = vpop.xlane.xlu0 %959  ;;  %2322 = vmatprep.subr.bf16.mxu1 %v2321_v53 }
 0x1af   : > { %v2898_v31 = vpop.eup %2375  ;;  %v963_v32 = vpop.xlane.xlu1 %962  ;;  %v1018_v54 = vsub.f32 %v2757_v59, %v960_v40  ;;  %v1117_v34 = vsel %vm339_vm0, %v2894_v25, 0.0  ;;  %1133 = vadd.xlane.f32.xlu0 %v1132_v56  ;;  %2324 = vmatpush3.bf16.msra.mxu1 %v2321_v53  ;;  %v1265_v53 = vld [vmem:[%s2882_s30 + $0x48] sm:$0xff] }
 0x1b0   : > { %2385 = vpow2.f32 %v1082_v41  ;;  %v1019_v39 = vsub.f32 %v2755_v58, %v963_v32  ;;  %1118 = vadd.xlane.f32.xlu1 %v1117_v34  ;;  %v1114_v57 = vsel %vm339_vm0, %v2898_v31, 0.0 }
 0x1b1   : > { %2387 = vpow2.f32 %v1080_v21  ;;  %v1068_v44 = vmul.f32 1.442695, %v1018_v54 }
 0x1b2   : > { %v2907_v51 = vpop.eup %2377  ;;  %v1070_v55 = vmul.f32 1.442695, %v1019_v39  ;;  %v984_v59 = vpop.xlane.xlu0 %983 }
 0x1b3   : > { %v2912_v58 = vpop.eup %2379  ;;  %v987_v5 = vpop.xlane.xlu1 %986  ;;  %v1026_v46 = vsub.f32 %v2763_v62, %v984_v59  ;;  %v1141_v27 = vsel %vm339_vm0, %v2907_v51, 0.0  ;;  %1115 = vadd.xlane.f32.xlu0 %v1114_v57 }
 0x1b4   : > { %2389 = vpow2.f32 %v1070_v55  ;;  %v1027_v10 = vsub.f32 %v2759_v60, %v987_v5  ;;  %1142 = vadd.xlane.f32.xlu1 %v1141_v27  ;;  %v1138_v15 = vsel %vm339_vm0, %v2912_v58, 0.0 }
 0x1b5   : > { %2391 = vpow2.f32 %v1068_v44  ;;  %v1084_v12 = vmul.f32 1.442695, %v1026_v46 }
 0x1b6   : > { %v2920_v14 = vpop.eup %2381  ;;  %v1086_v48 = vmul.f32 1.442695, %v1027_v10  ;;  %v966_v62 = vpop.xlane.xlu0 %965 }
 0x1b7   : > { %v2924_v35 = vpop.eup %2383  ;;  %v969_v60 = vpop.xlane.xlu1 %968  ;;  %v1020_v17 = vsub.f32 %v2769_v2, %v966_v62  ;;  %v1147_v52 = vsel %vm339_vm0, %v2920_v14, 0.0  ;;  %1139 = vadd.xlane.f32.xlu0 %v1138_v15  ;;  %v1264_v15 = vld [vmem:[%s2882_s30 + $0x40] sm:$0xff] }
 0x1b8   : > { %2393 = vpow2.f32 %v1086_v48  ;;  %v1021_v37 = vsub.f32 %v2767_v1, %v969_v60  ;;  %1148 = vadd.xlane.f32.xlu1 %v1147_v52  ;;  %v1144_v23 = vsel %vm339_vm0, %v2924_v35, 0.0  ;;  %v2325_v52 = vpack.c.bf16 %v1265_v53, %v1264_v15 }
 0x1b9   : > { %2395 = vpow2.f32 %v1084_v12  ;;  %v1072_v36 = vmul.f32 1.442695, %v1020_v17 }
 0x1ba   : > { %v2930_v20 = vpop.eup %2385  ;;  %v1074_v21 = vmul.f32 1.442695, %v1021_v37  ;;  %v990_v22 = vpop.xlane.xlu0 %989  ;;  %2326 = vmatprep.subr.bf16.mxu0 %v2325_v52 }
 0x1bb   : > { %v2934_v2 = vpop.eup %2387  ;;  %v993_v41 = vpop.xlane.xlu1 %992  ;;  %v1028_v40 = vsub.f32 %v2775_v0, %v990_v22  ;;  %v1171_v1 = vsel %vm339_vm0, %v2930_v20, 0.0  ;;  %1145 = vadd.xlane.f32.xlu0 %v1144_v23 }
 0x1bc   : > { %2397 = vpow2.f32 %v1074_v21  ;;  %v1029_v56 = vsub.f32 %v2771_v3, %v993_v41  ;;  %1172 = vadd.xlane.f32.xlu1 %v1171_v1  ;;  %v1168_v39 = vsel %vm339_vm0, %v2934_v2, 0.0  ;;  %v1268_v21 = vld [vmem:[%s2882_s30 + $0x60] sm:$0xff]  ;;  %v1269_v41 = vld [vmem:[%s2882_s30 + $0x68] sm:$0xff] }
 0x1bd   : > { %2399 = vpow2.f32 %v1072_v36  ;;  %v1088_v26 = vmul.f32 1.442695, %v1028_v40 }
 0x1be   : > { %v2940_v32 = vpop.eup %2389  ;;  %v1090_v54 = vmul.f32 1.442695, %v1029_v56  ;;  %v972_v34 = vpop.xlane.xlu0 %971  ;;  %v2333_v56 = vpack.c.bf16 %v1269_v41, %v1268_v21 }
 0x1bf   : > { %v2944_v44 = vpop.eup %2391  ;;  %v975_v0 = vpop.xlane.xlu1 %974  ;;  %v1022_v43 = vsub.f32 %v2781_v8, %v972_v34  ;;  %v1153_v42 = vsel %vm339_vm0, %v2940_v32, 0.0  ;;  %1169 = vadd.xlane.f32.xlu0 %v1168_v39 }
 0x1c0   : > { %2401 = vpow2.f32 %v1090_v54  ;;  %v1023_v3 = vsub.f32 %v2779_v7, %v975_v0  ;;  %1154 = vadd.xlane.f32.xlu1 %v1153_v42  ;;  %v1150_v47 = vsel %vm339_vm0, %v2944_v44, 0.0  ;;  %2334 = vmatprep.subr.bf16.mxu1 %v2333_v56 }
 0x1c1   : > { %2403 = vpow2.f32 %v1088_v26  ;;  %v1076_v45 = vmul.f32 1.442695, %v1022_v43 }
 0x1c2   : > { %v2950_v55 = vpop.eup %2393  ;;  %v1078_v59 = vmul.f32 1.442695, %v1023_v3  ;;  %v996_v57 = vpop.xlane.xlu0 %995 }
 0x1c3   : > { %v2954_v63 = vpop.eup %2395  ;;  %v999_v8 = vpop.xlane.xlu1 %998  ;;  %v1030_v5 = vsub.f32 %v2787_v11, %v996_v57  ;;  %v1177_v46 = vsel %vm339_vm0, %v2950_v55, 0.0  ;;  %1151 = vadd.xlane.f32.xlu0 %v1150_v47  ;;  %v1267_v57 = vld [vmem:[%s2882_s30 + $0x58] sm:$0xff] }
 0x1c4   : > { %2405 = vpow2.f32 %v1078_v59  ;;  %v1031_v7 = vsub.f32 %v2783_v9, %v999_v8  ;;  %1178 = vadd.xlane.f32.xlu1 %v1177_v46  ;;  %v1174_v12 = vsel %vm339_vm0, %v2954_v63, 0.0  ;;  %v1266_v59 = vld [vmem:[%s2882_s30 + $0x50] sm:$0xff] }
 0x1c5   : > { %2407 = vpow2.f32 %v1076_v45  ;;  %v1092_v27 = vmul.f32 1.442695, %v1030_v5 }
 0x1c6   : > { %v2960_v6 = vpop.eup %2397  ;;  %v1094_v10 = vmul.f32 1.442695, %v1031_v7 }
 0x1c7   : > { %v2964_v49 = vpop.eup %2399  ;;  %v1159_v11 = vsel %vm339_vm0, %v2960_v6, 0.0  ;;  %1175 = vadd.xlane.f32.xlu0 %v1174_v12  ;;  %v1270_v12 = vld [vmem:[%s2882_s30 + $0x70] sm:$0xff] }
 0x1c8   : > { %2409 = vpow2.f32 %v1094_v10  ;;  %1160 = vadd.xlane.f32.xlu1 %v1159_v11  ;;  %v1156_v29 = vsel %vm339_vm0, %v2964_v49, 0.0  ;;  %v2329_v10 = vpack.c.bf16 %v1267_v57, %v1266_v59  ;;  %v1271_v11 = vld [vmem:[%s2882_s30 + $0x78] sm:$0xff] }
 0x1c9   : > { %2411 = vpow2.f32 %v1092_v27 }
 0x1ca   : > { %v2968_v9 = vpop.eup %2401 }
 0x1cb   : > { %v2972_v48 = vpop.eup %2403  ;;  %v1183_v62 = vsel %vm339_vm0, %v2968_v9, 0.0  ;;  %1157 = vadd.xlane.f32.xlu0 %v1156_v29 }
 0x1cc   : > { %1184 = vadd.xlane.f32.xlu1 %v1183_v62  ;;  %v1180_v17 = vsel %vm339_vm0, %v2972_v48, 0.0 }
 0x1ce   : > { %v2978_v60 = vpop.eup %2405 }
 0x1cf   : > { %v2982_v37 = vpop.eup %2407  ;;  %v1165_v36 = vsel %vm339_vm0, %v2978_v60, 0.0  ;;  %1181 = vadd.xlane.f32.xlu0 %v1180_v17 }
 0x1d0   : > { %1166 = vadd.xlane.f32.xlu1 %v1165_v36  ;;  %v1162_v23 = vsel %vm339_vm0, %v2982_v37, 0.0 }
 0x1d2   : > { %v2987_v22 = vpop.eup %2409 }
 0x1d3   : > { %v2992_v40 = vpop.eup %2411  ;;  %v1189_v1 = vsel %vm339_vm0, %v2987_v22, 0.0  ;;  %1163 = vadd.xlane.f32.xlu0 %v1162_v23 }
 0x1d4   : > { %1190 = vadd.xlane.f32.xlu1 %v1189_v1  ;;  %v1186_v26 = vsel %vm339_vm0, %v2992_v40, 0.0 }
 0x1d7   : > { %1187 = vadd.xlane.f32.xlu0 %v1186_v26 }
 0x224   : > { %v1101_v54 = vpop.xlane.xlu1 %1100 }
 0x225   : > { %2413 = vrcp.f32 %v1101_v54 }
 0x228   : > { %v1125_v34 = vpop.xlane.xlu1 %1124  ;;  %v1098_v39 = vpop.xlane.xlu0 %1097 }
 0x229   : > { %2415 = vrcp.f32 %v1098_v39 }
 0x22a   : > { %2417 = vrcp.f32 %v1125_v34 }
 0x22c   : > { %v1122_v0 = vpop.xlane.xlu0 %1121 }
 0x22d   : > { %v1107_v43 = vpop.xlane.xlu1 %1106  ;;  %2419 = vrcp.f32 %v1122_v0 }
 0x22e   : > { %2421 = vrcp.f32 %v1107_v43 }
 0x22f   : > { %v2414_v45 = vpop.eup %2413 }
 0x230   : > { %v1104_v42 = vpop.xlane.xlu0 %1103  ;;  %v1195_v27 = vmul.f32 %v2414_v45, %v2827_v4 }
 0x231   : > { %v1131_v3 = vpop.xlane.xlu1 %1130  ;;  %2423 = vrcp.f32 %v1104_v42 }
 0x232   : > { %2425 = vrcp.f32 %v1131_v3 }
 0x233   : > { %v2416_v47 = vpop.eup %2415 }
 0x234   : > { %v1128_v8 = vpop.xlane.xlu0 %1127  ;;  %v1193_v46 = vmul.f32 %v2416_v47, %v2835_v19  ;;  %v2418_v7 = vpop.eup %2417  ;;  %v2337_v19 = vpack.c.bf16 %v1271_v11, %v1270_v12 }
 0x235   : > { %v1113_v5 = vpop.xlane.xlu1 %1112  ;;  %2427 = vrcp.f32 %v1128_v8  ;;  %v1211_v53 = vmul.f32 %v2418_v7, %v2831_v33 }
 0x236   : > { %2189 = vmatprep.mubr.msk.f32.mxu0 %vm339_vm0, %v1193_v46  ;;  %2429 = vrcp.f32 %v1113_v5 }
 0x237   : > { %v2420_v29 = vpop.eup %2419  ;;  %2190 = vmatmul.mubr.msk.f32.vlgmr.msra.gmra.mrb[16].mxu0 %vm339_vm0, %v1195_v27 }
 0x238   : > { %v1110_v62 = vpop.xlane.xlu0 %1109  ;;  %v1209_v15 = vmul.f32 %v2420_v29, %v2841_v24  ;;  %2328 = vmatpush3.bf16.msra.mxu0 %v2325_v52  ;;  %v2422_v36 = vpop.eup %2421 }
 0x239   : > { %v1137_v17 = vpop.xlane.xlu1 %1136  ;;  %2431 = vrcp.f32 %v1110_v62  ;;  %2330 = vmatprep.subr.bf16.mxu0 %v2329_v10  ;;  %v1199_v33 = vmul.f32 %v2422_v36, %v2845_v30 }
 0x23a   : > { %2209 = vmatprep.mubr.msk.f32.mxu1 %vm339_vm0, %v1209_v15  ;;  %2433 = vrcp.f32 %v1137_v17 }
 0x23b   : > { %v2424_v4 = vpop.eup %2423  ;;  %2210 = vmatmul.mubr.msk.f32.vlgmr.msra.gmra.mrb[16].mxu1 %vm339_vm0, %v1211_v53 }
 0x23c   : > { %v1134_v21 = vpop.xlane.xlu0 %1133  ;;  %v1197_v23 = vmul.f32 %v2424_v4, %v2849_v38  ;;  %2336 = vmatpush3.bf16.msra.mxu1 %v2333_v56  ;;  %2332 = vmatpush3.bf16.msra.mxu0 %v2329_v10  ;;  %v2426_v24 = vpop.eup %2425 }
 0x23d   : > { %v1119_v41 = vpop.xlane.xlu1 %1118  ;;  %2435 = vrcp.f32 %v1134_v21  ;;  %2338 = vmatprep.subr.bf16.mxu1 %v2337_v19  ;;  %v1215_v38 = vmul.f32 %v2426_v24, %v2855_v50 }
 0x23e   : > { %2192 = vmatprep.mubr.msk.f32.mxu0 %vm339_vm0, %v1197_v23  ;;  %2437 = vrcp.f32 %v1119_v41 }
 0x23f   : > { %v2428_v52 = vpop.eup %2427  ;;  %2193 = vmatmul.mubr.msk.f32.gmra.mrb[18].mxu0 %vm339_vm0, %v1199_v33 }
 0x240   : > { %v1116_v1 = vpop.xlane.xlu0 %1115  ;;  %v1213_v26 = vmul.f32 %v2428_v52, %v2859_v61  ;;  %2340 = vmatpush3.bf16.msra.mxu1 %v2337_v19  ;;  %v2430_v56 = vpop.eup %2429 }
 0x241   : > { %v1143_v54 = vpop.xlane.xlu1 %1142  ;;  %2439 = vrcp.f32 %v1116_v1  ;;  %v1203_v43 = vmul.f32 %v2430_v56, %v2865_v28 }
 0x242   : > { %2212 = vmatprep.mubr.msk.f32.mxu1 %vm339_vm0, %v1213_v26  ;;  %2441 = vrcp.f32 %v1143_v54 }
 0x243   : > { %v2432_v30 = vpop.eup %2431  ;;  %2213 = vmatmul.mubr.msk.f32.gmra.mrb[18].mxu1 %vm339_vm0, %v1215_v38 }
 0x244   : > { %v1140_v34 = vpop.xlane.xlu0 %1139  ;;  %v1201_v39 = vmul.f32 %v2432_v30, %v2869_v13  ;;  %v2434_v61 = vpop.eup %2433 }
 0x245   : > { %v1149_v0 = vpop.xlane.xlu1 %1148  ;;  %2443 = vrcp.f32 %v1140_v34  ;;  %v1219_v59 = vmul.f32 %v2434_v61, %v2875_v16 }
 0x246   : > { %2195 = vmatprep.mubr.msk.f32.mxu0 %vm339_vm0, %v1201_v39  ;;  %2445 = vrcp.f32 %v1149_v0 }
 0x247   : > { %v2436_v42 = vpop.eup %2435  ;;  %2196 = vmatmul.mubr.msk.f32.gmra.mrb[20].mxu0 %vm339_vm0, %v1203_v43 }
 0x248   : > { %v1146_v50 = vpop.xlane.xlu0 %1145  ;;  %v1217_v3 = vmul.f32 %v2436_v42, %v2886_v18  ;;  %v2438_v57 = vpop.eup %2437 }
 0x249   : > { %v1173_v45 = vpop.xlane.xlu1 %1172  ;;  %2447 = vrcp.f32 %v1146_v50  ;;  %v1207_v5 = vmul.f32 %v2438_v57, %v2894_v25 }
 0x24a   : > { %2215 = vmatprep.mubr.msk.f32.mxu1 %vm339_vm0, %v1217_v3  ;;  %2449 = vrcp.f32 %v1173_v45 }
 0x24b   : > { %v2440_v13 = vpop.eup %2439  ;;  %2216 = vmatmul.mubr.msk.f32.gmra.mrb[20].mxu1 %vm339_vm0, %v1219_v59 }
 0x24c   : > { %v1170_v28 = vpop.xlane.xlu0 %1169  ;;  %v1205_v47 = vmul.f32 %v2440_v13, %v2898_v31  ;;  %v2442_v46 = vpop.eup %2441 }
 0x24d   : > { %v1155_v8 = vpop.xlane.xlu1 %1154  ;;  %2451 = vrcp.f32 %v1170_v28  ;;  %v1223_v10 = vmul.f32 %v2442_v46, %v2907_v51 }
 0x24e   : > { %2198 = vmatprep.mubr.msk.f32.mxu0 %vm339_vm0, %v1205_v47  ;;  %2453 = vrcp.f32 %v1155_v8 }
 0x24f   : > { %v2444_v18 = vpop.eup %2443  ;;  %2199 = vmatmul.mubr.msk.f32.gmra.mrb[22].mxu0 %vm339_vm0, %v1207_v5 }
 0x250   : > { %v1152_v16 = vpop.xlane.xlu0 %1151  ;;  %v1221_v7 = vmul.f32 %v2444_v18, %v2912_v58  ;;  %v2446_v12 = vpop.eup %2445 }
 0x251   : > { %v1179_v27 = vpop.xlane.xlu1 %1178  ;;  %2455 = vrcp.f32 %v1152_v16  ;;  %v1227_v29 = vmul.f32 %v2446_v12, %v2920_v14 }
 0x252   : > { %2218 = vmatprep.mubr.msk.f32.mxu1 %vm339_vm0, %v1221_v7  ;;  %2457 = vrcp.f32 %v1179_v27 }
 0x253   : > { %v2448_v31 = vpop.eup %2447  ;;  %2219 = vmatmul.mubr.msk.f32.gmra.mrb[22].mxu1 %vm339_vm0, %v1223_v10 }
 0x254   : > { %v1176_v25 = vpop.xlane.xlu0 %1175  ;;  %v1225_v11 = vmul.f32 %v2448_v31, %v2924_v35  ;;  %v2450_v15 = vpop.eup %2449 }
 0x255   : > { %v1161_v62 = vpop.xlane.xlu1 %1160  ;;  %2459 = vrcp.f32 %v1176_v25  ;;  %v1243_v17 = vmul.f32 %v2450_v15, %v2930_v20 }
 0x256   : > { %2229 = vmatprep.mubr.msk.f32.mxu0 %vm339_vm0, %v1225_v11  ;;  %2461 = vrcp.f32 %v1161_v62 }
 0x257   : > { %v2452_v58 = vpop.eup %2451  ;;  %2230 = vmatmul.mubr.msk.f32.vlgmr.msra.gmra.mrb[24].mxu0 %vm339_vm0, %v1227_v29 }
 0x258   : > { %v1158_v51 = vpop.xlane.xlu0 %1157  ;;  %v1241_v53 = vmul.f32 %v2452_v58, %v2934_v2  ;;  %v2454_v36 = vpop.eup %2453 }
 0x259   : > { %v1185_v19 = vpop.xlane.xlu1 %1184  ;;  %2463 = vrcp.f32 %v1158_v51  ;;  %v1231_v23 = vmul.f32 %v2454_v36, %v2940_v32 }
 0x25a   : > { %2249 = vmatprep.mubr.msk.f32.mxu1 %vm339_vm0, %v1241_v53  ;;  %2465 = vrcp.f32 %v1185_v19 }
 0x25b   : > { %v2456_v14 = vpop.eup %2455  ;;  %2250 = vmatmul.mubr.msk.f32.vlgmr.msra.gmra.mrb[24].mxu1 %vm339_vm0, %v1243_v17 }
 0x25c   : > { %v1182_v35 = vpop.xlane.xlu0 %1181  ;;  %v1229_v4 = vmul.f32 %v2456_v14, %v2944_v44  ;;  %v2458_v41 = vpop.eup %2457 }
 0x25d   : > { %v1167_v21 = vpop.xlane.xlu1 %1166  ;;  %2467 = vrcp.f32 %v1182_v35  ;;  %v1247_v52 = vmul.f32 %v2458_v41, %v2950_v55 }
 0x25e   : > { %2232 = vmatprep.mubr.msk.f32.mxu0 %vm339_vm0, %v1229_v4  ;;  %2469 = vrcp.f32 %v1167_v21 }
 0x25f   : > { %v2460_v20 = vpop.eup %2459  ;;  %2233 = vmatmul.mubr.msk.f32.gmra.mrb[26].mxu0 %vm339_vm0, %v1231_v23 }
 0x260   : > { %v1164_v2 = vpop.xlane.xlu0 %1163  ;;  %v1245_v33 = vmul.f32 %v2460_v20, %v2954_v63  ;;  %v2462_v1 = vpop.eup %2461 }
 0x261   : > { %v1191_v24 = vpop.xlane.xlu1 %1190  ;;  %2471 = vrcp.f32 %v1164_v2  ;;  %v1235_v54 = vmul.f32 %v2462_v1, %v2960_v6 }
 0x262   : > { %2252 = vmatprep.mubr.msk.f32.mxu1 %vm339_vm0, %v1245_v33  ;;  %2473 = vrcp.f32 %v1191_v24 }
 0x263   : > { %v2464_v44 = vpop.eup %2463  ;;  %2253 = vmatmul.mubr.msk.f32.gmra.mrb[26].mxu1 %vm339_vm0, %v1247_v52 }
 0x264   : > { %v1188_v32 = vpop.xlane.xlu0 %1187  ;;  %v1233_v26 = vmul.f32 %v2464_v44, %v2964_v49  ;;  %v2466_v38 = vpop.eup %2465 }
 0x265   : > { %2475 = vrcp.f32 %v1188_v32  ;;  %v1251_v56 = vmul.f32 %v2466_v38, %v2968_v9 }
 0x266   : > { %2235 = vmatprep.mubr.msk.f32.mxu0 %vm339_vm0, %v1233_v26 }
 0x267   : > { %v2468_v63 = vpop.eup %2467  ;;  %2236 = vmatmul.mubr.msk.f32.gmra.mrb[28].mxu0 %vm339_vm0, %v1235_v54 }
 0x268   : > { %v1249_v55 = vmul.f32 %v2468_v63, %v2972_v48  ;;  %v2470_v30 = vpop.eup %2469 }
 0x269   : > { %v1239_v6 = vmul.f32 %v2470_v30, %v2978_v60 }
 0x26a   : > { %2255 = vmatprep.mubr.msk.f32.mxu1 %vm339_vm0, %v1249_v55 }
 0x26b   : > { %v2472_v34 = vpop.eup %2471  ;;  %2256 = vmatmul.mubr.msk.f32.gmra.mrb[28].mxu1 %vm339_vm0, %v1251_v56 }
 0x26c   : > { %v1237_v49 = vmul.f32 %v2472_v34, %v2982_v37  ;;  %v2474_v39 = vpop.eup %2473 }
 0x26d   : > { %v1255_v9 = vmul.f32 %v2474_v39, %v2987_v22 }
 0x26e   : > { %2238 = vmatprep.mubr.msk.f32.mxu0 %vm339_vm0, %v1237_v49 }
 0x26f   : > { %v2476_v0 = vpop.eup %2475  ;;  %2239 = vmatmul.mubr.msk.f32.gmra.mrb[30].mxu0 %vm339_vm0, %v1239_v6 }
 0x270   : > { %v1253_v48 = vmul.f32 %v2476_v0, %v2992_v40 }
 0x272   : > { %2258 = vmatprep.mubr.msk.f32.mxu1 %vm339_vm0, %v1253_v48 }
 0x273   : > { %2259 = vmatmul.mubr.msk.f32.gmra.mrb[30].mxu1 %vm339_vm0, %v1255_v9 }
 0x30a   : > { %v2191_v60 = vpop.f32.mrb[16].mxu0 }
 0x30b   : > { %1789 = vst.msk [vmem:[%s3071_s7 + $0x8] sm:$0xff] %vm339_vm0, %v2191_v60  ;;  %v1362_v37 = vpop.f32.mrb[17].mxu0 }
 0x30c   : > { %1788 = vst.msk [vmem:[%s3071_s7] sm:$0xff] %vm339_vm0, %v1362_v37 }
 0x30e   : > { %v2211_v22 = vpop.f32.mrb[16].mxu1 }
 0x30f   : > { %1797 = vst.msk [vmem:[%s3071_s7 + $0x48] sm:$0xff] %vm339_vm0, %v2211_v22  ;;  %v1491_v40 = vpop.f32.mrb[17].mxu1 }
 0x310   : > { %1796 = vst.msk [vmem:[%s3071_s7 + $0x40] sm:$0xff] %vm339_vm0, %v1491_v40 }
 0x312   : > { %v2194_v43 = vpop.f32.mrb[18].mxu0 }
 0x313   : > { %1791 = vst.msk [vmem:[%s3071_s7 + $0x18] sm:$0xff] %vm339_vm0, %v2194_v43  ;;  %v1372_v61 = vpop.f32.mrb[19].mxu0 }
 0x314   : > { %1790 = vst.msk [vmem:[%s3071_s7 + $0x10] sm:$0xff] %vm339_vm0, %v1372_v61 }
 0x316   : > { %v2214_v42 = vpop.f32.mrb[18].mxu1 }
 0x317   : > { %1799 = vst.msk [vmem:[%s3071_s7 + $0x58] sm:$0xff] %vm339_vm0, %v2214_v42  ;;  %v1501_v50 = vpop.f32.mrb[19].mxu1 }
 0x318   : > { %1798 = vst.msk [vmem:[%s3071_s7 + $0x50] sm:$0xff] %vm339_vm0, %v1501_v50 }
 0x31a   : > { %v2197_v3 = vpop.f32.mrb[20].mxu0 }
 0x31b   : > { %1793 = vst.msk [vmem:[%s3071_s7 + $0x28] sm:$0xff] %vm339_vm0, %v2197_v3  ;;  %v1382_v45 = vpop.f32.mrb[21].mxu0 }
 0x31c   : > { %1792 = vst.msk [vmem:[%s3071_s7 + $0x20] sm:$0xff] %vm339_vm0, %v1382_v45 }
 0x31e   : > { %v2217_v59 = vpop.f32.mrb[20].mxu1 }
 0x31f   : > { %1801 = vst.msk [vmem:[%s3071_s7 + $0x68] sm:$0xff] %vm339_vm0, %v2217_v59  ;;  %v1511_v57 = vpop.f32.mrb[21].mxu1 }
 0x320   : > { %1800 = vst.msk [vmem:[%s3071_s7 + $0x60] sm:$0xff] %vm339_vm0, %v1511_v57 }
 0x322   : > { %v2200_v13 = vpop.f32.mrb[22].mxu0 }
 0x323   : > { %1795 = vst.msk [vmem:[%s3071_s7 + $0x38] sm:$0xff] %vm339_vm0, %v2200_v13  ;;  %v1392_v28 = vpop.f32.mrb[23].mxu0 }
 0x324   : > { %1794 = vst.msk [vmem:[%s3071_s7 + $0x30] sm:$0xff] %vm339_vm0, %v1392_v28 }
 0x326   : > { %v2220_v47 = vpop.f32.mrb[22].mxu1 }
 0x327   : > { %1803 = vst.msk [vmem:[%s3071_s7 + $0x78] sm:$0xff] %vm339_vm0, %v2220_v47  ;;  %v1521_v8 = vpop.f32.mrb[23].mxu1 }
 0x328   : > { %1802 = vst.msk [vmem:[%s3071_s7 + $0x70] sm:$0xff] %vm339_vm0, %v1521_v8 }
 0x32a   : > { %v2231_v5 = vpop.f32.mrb[24].mxu0 }
 0x32b   : > { %1805 = vst.msk [vmem:[%s3071_s7 + $0x88] sm:$0xff] %vm339_vm0, %v2231_v5  ;;  %v1620_v46 = vpop.f32.mrb[25].mxu0 }
 0x32c   : > { %1804 = vst.msk [vmem:[%s3071_s7 + $0x80] sm:$0xff] %vm339_vm0, %v1620_v46 }
 0x32e   : > { %v2251_v18 = vpop.f32.mrb[24].mxu1 }
 0x32f   : > { %1813 = vst.msk [vmem:[%s3071_s7 + $0xc8] sm:$0xff] %vm339_vm0, %v2251_v18  ;;  %v1749_v16 = vpop.f32.mrb[25].mxu1 }
 0x330   : > { %1812 = vst.msk [vmem:[%s3071_s7 + $0xc0] sm:$0xff] %vm339_vm0, %v1749_v16 }
 0x332   : > { %v2234_v7 = vpop.f32.mrb[26].mxu0 }
 0x333   : > { %1807 = vst.msk [vmem:[%s3071_s7 + $0x98] sm:$0xff] %vm339_vm0, %v2234_v7  ;;  %v1630_v27 = vpop.f32.mrb[27].mxu0 }
 0x334   : > { %1806 = vst.msk [vmem:[%s3071_s7 + $0x90] sm:$0xff] %vm339_vm0, %v1630_v27 }
 0x336   : > { %v2254_v10 = vpop.f32.mrb[26].mxu1 }
 0x337   : > { %1815 = vst.msk [vmem:[%s3071_s7 + $0xd8] sm:$0xff] %vm339_vm0, %v2254_v10  ;;  %v1759_v12 = vpop.f32.mrb[27].mxu1 }
 0x338   : > { %1814 = vst.msk [vmem:[%s3071_s7 + $0xd0] sm:$0xff] %vm339_vm0, %v1759_v12 }
 0x33a   : > { %v2237_v31 = vpop.f32.mrb[28].mxu0 }
 0x33b   : > { %1809 = vst.msk [vmem:[%s3071_s7 + $0xa8] sm:$0xff] %vm339_vm0, %v2237_v31  ;;  %v1640_v25 = vpop.f32.mrb[29].mxu0 }
 0x33c   : > { %1808 = vst.msk [vmem:[%s3071_s7 + $0xa0] sm:$0xff] %vm339_vm0, %v1640_v25 }
 0x33e   : > { %v2257_v11 = vpop.f32.mrb[28].mxu1 }
 0x33f   : > { %1817 = vst.msk [vmem:[%s3071_s7 + $0xe8] sm:$0xff] %vm339_vm0, %v2257_v11  ;;  %v1769_v29 = vpop.f32.mrb[29].mxu1 }
 0x340   : > { %1816 = vst.msk [vmem:[%s3071_s7 + $0xe0] sm:$0xff] %vm339_vm0, %v1769_v29 }
 0x342   : > { %v2240_v62 = vpop.f32.mrb[30].mxu0 }
 0x343   : > { %1811 = vst.msk [vmem:[%s3071_s7 + $0xb8] sm:$0xff] %vm339_vm0, %v2240_v62  ;;  %v1650_v15 = vpop.f32.mrb[31].mxu0 }
 0x344   : > { %1810 = vst.msk [vmem:[%s3071_s7 + $0xb0] sm:$0xff] %vm339_vm0, %v1650_v15 }
 0x346   : > { %v2260_v58 = vpop.f32.mrb[30].mxu1 }
 0x347   : > { %1819 = vst.msk [vmem:[%s3071_s7 + $0xf8] sm:$0xff] %vm339_vm0, %v2260_v58  ;;  %v1779_v51 = vpop.f32.mrb[31].mxu1 }
 0x348   : > { %1818 = vst.msk [vmem:[%s3071_s7 + $0xf0] sm:$0xff] %vm339_vm0, %v1779_v51 }
 0x349 PF: > { %s15_s17 = sadd.s32 1, %s2483_s17  }
 0x34a   : > { %p12_p4 = scmp.ge.s32.totalorder %s15_s17, 4  }
 0x34c   :  { %14 = sbr.rel (!%p12_p4) target bundleno = 2 (0x2), region = 72 }

</bundles_post_ra>
